<compile_context>
chip_gen: v7x
topology: tpu7x:2x2x1
jax: 0.10.0
libtpu: 0.0.40
codegen_flags: <defaults>
</compile_context>

<pallas_src>
import jax
import jax.numpy as jnp
from jax import lax
from jax.experimental import pallas as pl
from jax.experimental.pallas import tpu as pltpu

_CONTRACT_LAST = (((1,), (1,)), ((), ()))  # contract last dim of both operands


def _lm_head_lora_kernel(x_ref, w_ref, out_ref):
    """One vocab tile of the fused frozen-linear + LoRA lm-head.

    x_ref:   [B, H+r]       resident   ([x_last || scaling * x_last @ A.T], stream dtype)
    w_ref:   [TILE_V, H+r]  streamed   ([W || lora_B] rows for this tile, stream dtype)
    out_ref: [B, TILE_V]    float32    lane-dense store
    """
    out_ref[...] = lax.dot_general(
        x_ref[...], w_ref[...], _CONTRACT_LAST, preferred_element_type=jnp.float32)


def _chip_budget():
    """Chip-aware (target W-tile bytes, vmem_limit_bytes)."""
    vmem_bytes = 64 * 1024 * 1024  # conservative fallback (v7x-sized)
    try:
        info = pltpu.get_tpu_info()
        vmem_bytes = int(getattr(info, "vmem_capacity_bytes", vmem_bytes))
    except Exception:
        pass
    if vmem_bytes >= 96 * 1024 * 1024:
        # v5e / v6e: 128 MiB physical VMEM -> big tiles, generous scoped limit.
        return 24 * 1024 * 1024, 96 * 1024 * 1024
    # v7x: 64 MiB physical VMEM -> 2 x 14 MiB double-buffered tiles + out fits in 48 MiB.
    return 14 * 1024 * 1024, 48 * 1024 * 1024


def _select_tile_v(v_pad, row_bytes, target_bytes):
    """Largest 128-multiple tile that divides v_pad, fits target_bytes, and keeps
    >= 2 (preferably an even number of) grid steps for v7x megacore sharding."""
    u = v_pad // 128                       # vocab extent in units of 128 rows
    t_cap = max(1, int(target_bytes // (128 * row_bytes)))
    t_cap = min(t_cap, u)
    if u >= 2:
        t_cap = max(1, min(t_cap, u // 2))  # force >= 2 tiles when possible
    best, best_even = 1, None
    for t in range(1, t_cap + 1):
        if u % t == 0:
            best = t
            if (u // t) % 2 == 0:
                best_even = t               # prefer an even tile count
    t = best_even if best_even is not None else best
    return t * 128


def prepare_lm_head_params(w, lora_b, *, stream_dtype=jnp.bfloat16):
    """One-time (load-time) weight preparation. NOT on the per-forward path.

    w:      [V, H]  frozen lm_head rows (id_list selection)
    lora_b: [V, r]  lora_B rows (id_list selection)
    Returns dict with w_cat = [W || lora_B] padded to a 128-multiple of V.
    """
    assert jnp.issubdtype(jnp.dtype(stream_dtype), jnp.floating), (
        "streaming dtype must be a float type (int8 lm_head would need explicit dequant)")
    V, H = w.shape
    r = lora_b.shape[1]
    w_cat = jnp.concatenate(
        [w.astype(stream_dtype), lora_b.astype(stream_dtype)], axis=1)   # [V, H+r]
    v_pad = -(-V // 128) * 128
    if v_pad != V:
        # One-time pad at load; the forward pass never pads.
        w_cat = jnp.pad(w_cat, ((0, v_pad - V), (0, 0)))
    return {"w_cat": w_cat, "v_orig": V, "hidden": H, "rank": r}


def custom_lm_head_lora(x, lora_a, prepared, scaling):
    """x: [B, S, H]; lora_a: [r, H]; prepared: output of prepare_lm_head_params.

    Returns float32 logits [B, V] (V = len(id_list))."""
    w_cat = prepared["w_cat"]
    v_orig, H, r = prepared["v_orig"], prepared["hidden"], prepared["rank"]
    v_pad, hr = w_cat.shape
    compute_dtype = w_cat.dtype

    # Glue (slice + cast), matching `x[:, -1, :].to(torch.float32)`.
    x_last = x[:, -1, :].astype(jnp.float32)                              # [B, H]
    Bsz = x_last.shape[0]

    # Hoisted LoRA down-projection (tiny [B, r]); fold `scaling` in here so the
    # per-tile kernel does no per-element scaling on [B, TILE_V].
    ax_scaled = (x_last @ lora_a.astype(jnp.float32).T) * jnp.float32(scaling)

    # Fused activation: [x_last || scaled x@A.T] -> one matmul per vocab tile.
    x_cat = jnp.concatenate(
        [x_last.astype(compute_dtype), ax_scaled.astype(compute_dtype)], axis=1)  # [B, H+r]

    itemsize = jnp.dtype(compute_dtype).itemsize
    row_bytes = hr * itemsize
    target_bytes, vmem_limit = _chip_budget()
    tile_v = _select_tile_v(v_pad, row_bytes, target_bytes)
    grid = (v_pad // tile_v,)

    out = pl.pallas_call(
        _lm_head_lora_kernel,
        out_shape=jax.ShapeDtypeStruct((Bsz, v_pad), jnp.float32),
        grid_spec=pltpu.PrefetchScalarGridSpec(
            num_scalar_prefetch=0,
            grid=grid,
            in_specs=[
                pl.BlockSpec((Bsz, hr), lambda j: (0, 0)),       # x_cat: resident
                pl.BlockSpec((tile_v, hr), lambda j: (j, 0)),    # [W||B] tile: streamed
            ],
            out_specs=pl.BlockSpec((Bsz, tile_v), lambda j: (0, j)),  # lane-dense store
        ),
        compiler_params=pltpu.CompilerParams(
            # V tiles are independent -> shard across TensorCores on v7x; no-op on v5e/v6e.
            dimension_semantics=("parallel",),
            vmem_limit_bytes=vmem_limit,
        ),
        cost_estimate=pl.CostEstimate(
            flops=2 * Bsz * v_pad * hr,
            bytes_accessed=v_pad * row_bytes + Bsz * hr * itemsize + Bsz * v_pad * 4,
            transcendentals=0,
        ),
    )(x_cat, w_cat)

    if v_pad != v_orig:
        # Only taken when id_list length is not 128-aligned (never in the pre-padded case).
        out = out[:, :v_orig]
    return out


def wrapped_model_forward(x, lora_a, prepared, scaling):
    """WrappedModel.forward: run the (stubbed) backbone, return float32 logits."""
    logits = custom_lm_head_lora(x, lora_a, prepared, scaling)
    return logits.astype(jnp.float32)


def _reference(x, w, a, b, scaling):
    x_last = x[:, -1, :].astype(jnp.float32)
    w = w.astype(jnp.float32)
    a = a.astype(jnp.float32)
    b = b.astype(jnp.float32)
    linear_out = x_last @ w.T
    lora_out = (x_last @ a.T) @ b.T
    return linear_out + lora_out * scaling


if __name__ == "__main__":
    # Small shapes consistent with the module's forward:
    #   batch B=2, seq S=8, hidden H=32, len(id_list) V=16, lora_r r=4, lora_alpha=8
    B, S, H = 2, 8, 32
    V, r = 16, 4
    lora_alpha, lora_r = 8, 4
    scaling = lora_alpha / lora_r

    key = jax.random.PRNGKey(0)
    kx, kw, ka, kb = jax.random.split(key, 4)

    x = jax.random.normal(kx, (B, S, H), dtype=jnp.float32)
    w = jax.random.normal(kw, (V, H), dtype=jnp.float32) * 0.05   # frozen lm_head rows
    a = jax.random.normal(ka, (r, H), dtype=jnp.float32) * 0.05   # lora_A
    b = jax.random.normal(kb, (V, r), dtype=jnp.float32) * 0.05   # lora_B rows

    ref = _reference(x, w, a, b, scaling)

    # f32 streaming path: exact match against the PyTorch-equivalent reference.
    prepared_f32 = prepare_lm_head_params(w, b, stream_dtype=jnp.float32)
    out_f32 = jax.block_until_ready(wrapped_model_forward(x, a, prepared_f32, scaling))
    assert out_f32.shape == (B, V)
    assert out_f32.dtype == jnp.float32
    assert jnp.allclose(out_f32, ref, atol=1e-5, rtol=1e-5), "f32 mismatch vs reference"

    # bf16 streaming path (default: halves HBM traffic): loose tolerance vs f32 reference.
    prepared_bf16 = prepare_lm_head_params(w, b, stream_dtype=jnp.bfloat16)
    out_bf16 = jax.block_until_ready(wrapped_model_forward(x, a, prepared_bf16, scaling))
    assert out_bf16.shape == (B, V)
    assert out_bf16.dtype == jnp.float32
    assert jnp.allclose(out_bf16, ref, atol=2e-2, rtol=5e-2), "bf16 mismatch vs reference"

    print("KERNEL_OK")
</pallas_src>

<mosaic_0001>
module attributes {stable_mosaic.version = 11 : i64} {
  func.func @_lm_head_lora_kernel(%arg0: i32, %arg1: memref<2x36xf32, #tpu.memory_space<vmem>>, %arg2: memref<128x36xf32, #tpu.memory_space<vmem>>, %arg3: memref<2x128xf32, #tpu.memory_space<vmem>>) attributes {dimension_semantics = [#tpu.dimension_semantics<parallel>], iteration_bounds = array<i64: 1>, scalar_prefetch = 0 : i64, scratch_operands = 0 : i64, tpu.core_type = #tpu.core_type<tc>, window_params = [{pipeline_mode = #tpu.pipeline_mode<synchronous>, transform_indices = @transform_0, window_bounds = array<i64: 2, 36>}, {transform_indices = @transform_1, window_bounds = array<i64: 128, 36>}, {transform_indices = @transform_2, window_bounds = array<i64: 2, 128>}]} {
    %c0 = arith.constant 0 : index
    %c0_0 = arith.constant 0 : index
    %0 = vector.load %arg1[%c0, %c0_0] : memref<2x36xf32, #tpu.memory_space<vmem>>, vector<2x36xf32>
    %c0_1 = arith.constant 0 : index
    %c0_2 = arith.constant 0 : index
    %1 = vector.load %arg2[%c0_1, %c0_2] : memref<128x36xf32, #tpu.memory_space<vmem>>, vector<128x36xf32>
    %cst = arith.constant dense<0.000000e+00> : vector<2x128xf32>
    %2 = tpu.matmul %0, %1, %cst {dimension_numbers = #tpu.dot_dimension_numbers<[1], [1], [0], [0], [0, 0, 1, 0], [], []>} : vector<2x36xf32>, vector<128x36xf32>, vector<2x128xf32> -> vector<2x128xf32>
    %c0_3 = arith.constant 0 : index
    %c0_4 = arith.constant 0 : index
    %3 = vector.load %arg3[%c0_3, %c0_4] : memref<2x128xf32, #tpu.memory_space<vmem>>, vector<2x128xf32>
    tpu.vector_store %arg3[%c0_3, %c0_4], %2 {strides = array<i32>} : memref<2x128xf32, #tpu.memory_space<vmem>>, vector<2x128xf32>,
    return
  }
  func.func @transform_0(%arg0: i32) -> (i32, i32) {
    %c0_i32 = arith.constant 0 : i32
    %c0_i32_0 = arith.constant 0 : i32
    %c0_i32_1 = arith.constant 0 : i32
    return %c0_i32, %c0_i32_0 : i32, i32
  }
  func.func @transform_1(%arg0: i32) -> (i32, i32) {
    %c0_i32 = arith.constant 0 : i32
    %c0_i32_0 = arith.constant 0 : i32
    return %arg0, %c0_i32 : i32, i32
  }
  func.func @transform_2(%arg0: i32) -> (i32, i32) {
    %c0_i32 = arith.constant 0 : i32
    %c0_i32_0 = arith.constant 0 : i32
    return %c0_i32, %arg0 : i32, i32
  }
}

</mosaic_0001>

<bundles_post_ra>
// kernel: tpu_custom_call.1
= control target key start
LH: loop header
LB: loop body
LE: loop exit
PB: predicated region body
PF: predicated region fallthrough
CT: control target
= control target key end

     0   :  { %vm29_vm0 = vcmask 293888   ;;  %v295_v2 = vmov 0.0|0.0   ;;  %vm296_vm2 = vmmov 0   ;;  %v297_v5 = vmov 0.0   ;;  %s400_s0 = inlined_call_operand.vmem [shape: f32[2,36], index: 0, kind: input, shape index: {}]   ;;  %s401_s1 = inlined_call_operand.vmem [shape: f32[128,36], index: 1, kind: input, shape index: {}]   ;;  %s402_s2 = inlined_call_operand.hbm [shape: f32[2,128], index: 2, kind: output, shape index: {}]  }
   0x1   :  { %v13_v0 = vld [vmem:[%s401_s1] sm:$0xff]  ;;  %v14_v1 = vld [vmem:[%s401_s1 + $0x8] sm:$0xff]  ;;  %235 = vmatprep.subr.bf16.mxu0 %v295_v2  ;;  %vm322_vm1 = vmpackc.low %vm29_vm0, %vm29_vm0  ;;  %232 = vmatprep.mubr.msk.f32.mxu0 %vm296_vm2, %v297_v5 }
   0x2   :  { %v236_v3 = vpack.c.bf16 %v14_v1, %v13_v0  ;;  %v15_v6 = vld [vmem:[%s401_s1 + $0x10] sm:$0xff]  ;;  %v16_v7 = vld [vmem:[%s401_s1 + $0x18] sm:$0xff] }
   0x4   :  { %238 = vmatpush3.bf16.xpose.msk.msra.mxu0 %vm322_vm1, %v236_v3 }
   0x5   :  { %239 = vmatprep.subr.bf16.mxu0 %v295_v2 }
   0x6   :  { %7 = vsyncpa [#allocation3], 0  ;;  %v240_v8 = vpack.c.bf16 %v16_v7, %v15_v6  ;;  %v17_v9 = vld [vmem:[%s401_s1 + $0x20] sm:$0xff]  ;;  %v18_v10 = vld [vmem:[%s401_s1 + $0x28] sm:$0xff]  ;;  %s298_s15 = smov [#allocation2]  }
   0x7   :  { %v244_v11 = vpack.c.bf16 %v18_v10, %v17_v9  ;;  %v19_v12 = vld [vmem:[%s401_s1 + $0x30] sm:$0xff]  ;;  %v20_v13 = vld [vmem:[%s401_s1 + $0x38] sm:$0xff]  ;;  %v21_v15 = vld [vmem:[%s401_s1 + $0x40] sm:$0xff]  ;;  %s158_s16 = sshll.u32 %s298_s15, 4  ;;  %s159_s16 = int_to_ptr.vmem [resolvable:$true] %s158_s16 }
   0x8   :  { %v248_v14 = vpack.c.bf16 %v20_v13, %v19_v12  ;;  %v22_v16 = vld [vmem:[%s401_s1 + $0x48] sm:$0xff]  ;;  %v23_v18 = vld [vmem:[%s401_s1 + $0x50] sm:$0xff]  ;;  %v24_v19 = vld [vmem:[%s401_s1 + $0x58] sm:$0xff]  ;;  %s271_s17 = scalar_lea.vmem %s159_s16, 32  ;;  %p276_p1 = scmp.lt.s32.totalorder %s159_s16, %s159_s16 }
   0x9   :  { %v252_v17 = vpack.c.bf16 %v22_v16, %v21_v15  ;;  %v256_v20 = vpack.c.bf16 %v24_v19, %v23_v18  ;;  %v25_v21 = vld [vmem:[%s401_s1 + $0x60] sm:$0xff]  ;;  %v26_v22 = vld [vmem:[%s401_s1 + $0x68] sm:$0xff]  ;;  %v27_v24 = vld [vmem:[%s401_s1 + $0x70] sm:$0xff]  ;;  %p272_p0 = scmp.ne.s32.totalorder %s159_s16, %s271_s17  ;;  %p277_p2 = scmp.lt.s32.totalorder %s271_s17, %s271_s17 }
   0xa   :  { %v260_v23 = vpack.c.bf16 %v26_v22, %v25_v21  ;;  %v28_v25 = vld [vmem:[%s401_s1 + $0x78] sm:$0xff]  ;;  %v12_v27 = vld [vmem:[%s400_s0] sm:$0x3] }
   0xb   :  { %v264_v26 = vpack.c.bf16 %v28_v25, %v27_v24  ;;  %p278_p3 = por %p277_p2, %p276_p1 }
   0xc   :  { %242 = vmatpush3.bf16.xpose.msk.msra.mxu0 %vm322_vm1, %v240_v8 }
   0xd   :  { %243 = vmatprep.subr.bf16.mxu0 %v295_v2  ;;  %p279_p4 = pnand %p278_p3, %p272_p0 }
  0x14   :  { %246 = vmatpush3.bf16.xpose.msk.msra.mxu0 %vm322_vm1, %v244_v11 }
  0x15   :  { %247 = vmatprep.subr.bf16.mxu0 %v295_v2 }
  0x1c   :  { %250 = vmatpush3.bf16.xpose.msk.msra.mxu0 %vm322_vm1, %v248_v14 }
  0x1d   :  { %251 = vmatprep.subr.bf16.mxu0 %v295_v2 }
  0x24   :  { %254 = vmatpush3.bf16.xpose.msk.msra.mxu0 %vm322_vm1, %v252_v17 }
  0x25   :  { %255 = vmatprep.subr.bf16.mxu0 %v295_v2 }
  0x2c   :  { %258 = vmatpush3.bf16.xpose.msk.msra.mxu0 %vm322_vm1, %v256_v20 }
  0x2d   :  { %259 = vmatprep.subr.bf16.mxu0 %v295_v2 }
  0x34   :  { %262 = vmatpush3.bf16.xpose.msk.msra.mxu0 %vm322_vm1, %v260_v23 }
  0x35   :  { %263 = vmatprep.subr.bf16.mxu0 %v295_v2 }
  0x3c   :  { %266 = vmatpush3.bf16.xpose.msk.msra.mxu0 %vm322_vm1, %v264_v26 }
  0x43   :  { %233 = vmatmul.mubr.msk.f32.vlgmr.msra.gmra.mrb[0].mxu0 %vm29_vm0, %v12_v27 }
 0x116   :  { %v147_v28 = vpop.f32.mrb[0].mxu0 }
 0x117   :  { %151 = vst [vmem:[#allocation2] sm:$0x3] %v147_v28  ;;  %v234_v29 = vpop.f32.mrb[1].mxu0 }
 0x118   :  { %282 = shalt.err (!%p279_p4)
}
 0x119   :  { %s283_s19 = scalar_lea.hbm %s402_s2, 32 }
 0x11a   :  { %p284_p5 = scmp.ne.s32.totalorder %s402_s2, %s283_s19  ;;  %p287_p6 = scmp.lt.u32.totalorder %s283_s19, %s402_s2 }
 0x11c   :  { %p289_p7 = pnand %p287_p6, %p284_p5 }
 0x11e   :  { %292 = shalt.err (!%p289_p7)
}
 0x11f   :  { %161 = dma.vmem_to_hbm [thread:$0]  %s159_s16, 32, %s402_s2, [#allocation3]  }
 0x120   :  { %293 = dma.done.wait [#allocation3], 32  }
 0x121   :  { %294 = vsyncadd [#allocation3], 4294967264 }
 0x122   :  { %165 = vsyncpa [#allocation3], 1 }

</bundles_post_ra>
